<compile_context>
chip_gen: v7x
topology: tpu7x:2x2x1
jax: 0.10.0
libtpu: 0.0.40
codegen_flags: <defaults>
</compile_context>

<pallas_src>
import functools

import jax
import jax.numpy as jnp
from jax.experimental import pallas as pl
from jax.experimental.pallas import tpu as pltpu

HEADS = 8
LN_EPS = 1e-5
# Safe on every generation: v5e/v6e have 128 MiB physical VMEM, v7x has 64 MiB.
VMEM_LIMIT_BYTES = 48 * 1024 * 1024


def _layernorm_f32(x, gamma, beta):
    # x: (S, D) f32, gamma/beta: (1, D) f32
    mean = jnp.mean(x, axis=-1, keepdims=True)
    var = jnp.mean(jnp.square(x - mean), axis=-1, keepdims=True)
    return (x - mean) * jax.lax.rsqrt(var + LN_EPS) * gamma + beta


# --------------------------------------------------------------------------- #
# Kernel 1: per-(batch, context-tile) LayerNorm + fused K|V projection.       #
# Runs once per context element (NOT once per query tile).                    #
# --------------------------------------------------------------------------- #
def kv_proj_kernel(c_ref, wkv_ref, gamma_ref, beta_ref, kv_ref):
    # c_ref:   (1, Tm, D) f32     context tile
    # wkv_ref: (D, 2D)    bf16    [Wk^T | Wv^T] fused
    # kv_ref:  (1, Tm, 2D) bf16   output
    tm, d = c_ref.shape[1], c_ref.shape[2]
    cn = _layernorm_f32(c_ref[0], gamma_ref[...], beta_ref[...]).astype(jnp.bfloat16)
    kv = jnp.dot(cn, wkv_ref[...], preferred_element_type=jnp.float32)
    kv_ref[...] = kv.astype(jnp.bfloat16).reshape(1, tm, 2 * d)


# --------------------------------------------------------------------------- #
# Kernel 2: fused LayerNorm(x) + Q projection + online-softmax attention +    #
# output projection.  Grid = (batch, q-tile, m-tile); m-tile is "arbitrary".  #
# --------------------------------------------------------------------------- #
def cross_attn_kernel(x_ref, kv_ref, alibi_ref,
                      wq_ref, wo_ref, bo_ref, gamma_ref, beta_ref,
                      out_ref,
                      q_sc, m_sc, l_sc, acc_sc,
                      *, lane_dense_out):
    # x_ref:     (1, Tq, D)       f32
    # kv_ref:    (1, Tm, 2D)      bf16   [K | V] for this context tile
    # alibi_ref: (1, H, Tq, Tm)   bf16
    # wq_ref:    (D, D)           bf16   Wq^T with 1/sqrt(dh) folded in
    # wo_ref:    (D, D)           bf16   Wo^T
    # bo/gamma/beta: (1, D)       f32
    # out_ref:   (1, 1, Tq*D) f32 (lane-dense slab, D < 128)  or  (1, Tq, D) f32
    # scratch:   q_sc (H,Tq,dh) bf16; m_sc/l_sc (H,Tq,1) f32; acc_sc (H,Tq,dh) f32
    mi = pl.program_id(2)
    n_m = pl.num_programs(2)

    tq, d = x_ref.shape[1], x_ref.shape[2]
    tm = kv_ref.shape[1]
    h = alibi_ref.shape[1]
    dh = d // h

    @pl.when(mi == 0)
    def _():
        # Per-query-tile work done exactly once: LN(x) + Q projection + relayout.
        xn = _layernorm_f32(x_ref[0], gamma_ref[...], beta_ref[...]).astype(jnp.bfloat16)
        q = jnp.dot(xn, wq_ref[...], preferred_element_type=jnp.float32)   # (Tq, D)
        q_sc[...] = pltpu.einshape("mhd->hmd",
                                   q.astype(jnp.bfloat16).reshape(tq, h, dh))
        m_sc[...] = jnp.full_like(m_sc, -jnp.inf)
        l_sc[...] = jnp.zeros_like(l_sc)
        acc_sc[...] = jnp.zeros_like(acc_sc)

    # Split the fused K|V tile and relayout once to head-batched (H, Tm, dh).
    kv = kv_ref[0]                                   # (Tm, 2D) bf16
    k = kv[:, :d]
    v = kv[:, d:]
    kh = pltpu.einshape("mhd->hmd", k.reshape(tm, h, dh))
    vh = pltpu.einshape("mhd->hmd", v.reshape(tm, h, dh))

    # Scores for all heads at once (softmax scale is pre-folded into Wq),
    # bias added in f32 so the max-subtraction numerics are preserved.
    s = jnp.einsum("hqd,hkd->hqk", q_sc[...], kh,
                   preferred_element_type=jnp.float32)          # (H, Tq, Tm)
    s = s + alibi_ref[0].astype(jnp.float32)

    # Online softmax update.
    m_new = jnp.maximum(m_sc[...], jnp.max(s, axis=-1, keepdims=True))
    alpha = jnp.exp(m_sc[...] - m_new)
    p = jnp.exp(s - m_new)
    l_sc[...] = alpha * l_sc[...] + jnp.sum(p, axis=-1, keepdims=True)
    acc_sc[...] = alpha * acc_sc[...] + jnp.einsum(
        "hqk,hkd->hqd", p.astype(jnp.bfloat16), vh,
        preferred_element_type=jnp.float32)                      # (H, Tq, dh)
    m_sc[...] = m_new

    @pl.when(mi == n_m - 1)
    def _():
        # Exact normalization (only (H, Tq, 1) elements — essentially free),
        # then one (Tq, D) @ (D, D) output-projection GEMM.
        o = acc_sc[...] / l_sc[...]
        o2 = pltpu.einshape("hmd->mhd", o).reshape(tq, d).astype(jnp.bfloat16)
        out = jnp.dot(o2, wo_ref[...], preferred_element_type=jnp.float32)
        out = out + bo_ref[...]
        if lane_dense_out:
            out_ref[...] = out.reshape(1, 1, tq * d)     # lane-dense slab (D < 128)
        else:
            out_ref[...] = out.reshape(1, tq, d)         # D % 128 == 0: direct store


def cross_attention(x, context, alibi, params, *, block_q=None, block_m=None):
    """x: (B, N, D), context: (B, M, D), alibi: (B, H, N, M). Returns (B, N, D)."""
    B, N, D = x.shape
    _, M, _ = context.shape
    H = HEADS
    dh = D // H

    # Production guidance: block_q >= 256 and block_m >= 256 on v6e/v7x (fill the
    # 256-wide MXU), >= 128 on v5e; sized so the bf16 alibi tile + x/kv/out tiles
    # fit the VMEM budget below.  Demo sizes use one tile.
    if block_q is None:
        block_q = min(N, 256)
    if block_m is None:
        block_m = min(M, 512)
    assert N % block_q == 0 and M % block_m == 0
    n_q = N // block_q
    n_m = M // block_m

    wq_t, wk_t, wv_t, wo_t, bo, gamma, beta = params

    # Wrapper-side (free) weight prep: fold the softmax scale into Wq, fuse Wk|Wv
    # into one (D, 2D) matrix, cast matmul weights to bf16.
    scale = dh ** (-0.5)
    wq_s = (wq_t * scale).astype(jnp.bfloat16)
    wkv = jnp.concatenate([wk_t, wv_t], axis=1).astype(jnp.bfloat16)
    wo_b = wo_t.astype(jnp.bfloat16)
    bo2 = bo.reshape(1, D).astype(jnp.float32)
    gamma2 = gamma.reshape(1, D).astype(jnp.float32)
    beta2 = beta.reshape(1, D).astype(jnp.float32)

    # Halve the dominant HBM stream (added back in f32 inside the kernel).
    alibi_bf = alibi.astype(jnp.bfloat16)

    resident = dict(pipeline_mode=pl.Buffered(1))   # single-buffer constant blocks

    # ---- Kernel 1: K/V projection, once per (batch, context tile). ----
    kv_cost = pl.CostEstimate(
        flops=4 * B * M * D * D, transcendentals=0,
        bytes_accessed=(context.size * 4 + wkv.size * 2
                        + (gamma2.size + beta2.size) * 4 + B * M * 2 * D * 2))
    kv = pl.pallas_call(
        kv_proj_kernel,
        out_shape=jax.ShapeDtypeStruct((B, M, 2 * D), jnp.bfloat16),
        grid=(B, n_m),
        in_specs=[
            pl.BlockSpec((1, block_m, D), lambda b, mi: (b, mi, 0)),      # context
            pl.BlockSpec((D, 2 * D), lambda b, mi: (0, 0), **resident),   # [Wk|Wv]
            pl.BlockSpec((1, D), lambda b, mi: (0, 0), **resident),       # gamma
            pl.BlockSpec((1, D), lambda b, mi: (0, 0), **resident),       # beta
        ],
        out_specs=pl.BlockSpec((1, block_m, 2 * D), lambda b, mi: (b, mi, 0)),
        compiler_params=pltpu.CompilerParams(
            dimension_semantics=("parallel", "parallel"),
            vmem_limit_bytes=VMEM_LIMIT_BYTES),
        cost_estimate=kv_cost,
    )(context, wkv, gamma2, beta2)

    # ---- Kernel 2: attention with online softmax over context tiles. ----
    lane_dense_out = (D % 128 != 0)
    if lane_dense_out:
        out_shape = jax.ShapeDtypeStruct((B, n_q, block_q * D), jnp.float32)
        out_spec = pl.BlockSpec((1, 1, block_q * D), lambda b, qi, mi: (b, qi, 0))
    else:
        out_shape = jax.ShapeDtypeStruct((B, N, D), jnp.float32)
        out_spec = pl.BlockSpec((1, block_q, D), lambda b, qi, mi: (b, qi, 0))

    attn_cost = pl.CostEstimate(
        flops=B * (2 * N * D * D        # q projection
                   + 4 * N * M * D      # scores + attn@v over all heads
                   + 2 * N * D * D),    # output projection
        transcendentals=B * H * N * M,
        bytes_accessed=(x.size * 4 + kv.size * 2 + alibi_bf.size * 2
                        + (wq_s.size + wo_b.size) * 2
                        + (bo2.size + gamma2.size + beta2.size) * 4
                        + B * N * D * 4))

    kernel = functools.partial(cross_attn_kernel, lane_dense_out=lane_dense_out)
    out = pl.pallas_call(
        kernel,
        out_shape=out_shape,
        grid=(B, n_q, n_m),
        in_specs=[
            pl.BlockSpec((1, block_q, D), lambda b, qi, mi: (b, qi, 0)),          # x
            pl.BlockSpec((1, block_m, 2 * D), lambda b, qi, mi: (b, mi, 0)),      # K|V
            pl.BlockSpec((1, H, block_q, block_m),
                         lambda b, qi, mi: (b, 0, qi, mi)),                       # alibi
            pl.BlockSpec((D, D), lambda b, qi, mi: (0, 0), **resident),           # Wq*scale
            pl.BlockSpec((D, D), lambda b, qi, mi: (0, 0), **resident),           # Wo
            pl.BlockSpec((1, D), lambda b, qi, mi: (0, 0), **resident),           # bo
            pl.BlockSpec((1, D), lambda b, qi, mi: (0, 0), **resident),           # gamma
            pl.BlockSpec((1, D), lambda b, qi, mi: (0, 0), **resident),           # beta
        ],
        out_specs=out_spec,
        scratch_shapes=[
            pltpu.VMEM((H, block_q, dh), jnp.bfloat16),   # q (head-batched)
            pltpu.VMEM((H, block_q, 1), jnp.float32),     # running max
            pltpu.VMEM((H, block_q, 1), jnp.float32),     # running sum
            pltpu.VMEM((H, block_q, dh), jnp.float32),    # output accumulator
        ],
        compiler_params=pltpu.CompilerParams(
            dimension_semantics=("parallel", "parallel", "arbitrary"),
            vmem_limit_bytes=VMEM_LIMIT_BYTES),
        cost_estimate=attn_cost,
    )(x, kv, alibi_bf, wq_s, wo_b, bo2, gamma2, beta2)

    if lane_dense_out:
        out = out.reshape(B, N, D)
    return out


def cross_attention_ref(x, context, alibi, params):
    """Pure-JAX f32 reference mirroring the PyTorch forward."""
    wq_t, wk_t, wv_t, wo_t, bo, gamma, beta = params
    B, N, D = x.shape
    M = context.shape[1]
    H = HEADS
    dh = D // H
    scale = dh ** (-0.5)

    def ln(t):
        mean = jnp.mean(t, axis=-1, keepdims=True)
        var = jnp.mean((t - mean) ** 2, axis=-1, keepdims=True)
        return (t - mean) * jax.lax.rsqrt(var + LN_EPS) * gamma + beta

    xn, cn = ln(x), ln(context)
    q = xn @ wq_t
    k = cn @ wk_t
    v = cn @ wv_t
    q = q.reshape(B, N, H, dh).transpose(0, 2, 1, 3)
    k = k.reshape(B, M, H, dh).transpose(0, 2, 1, 3)
    v = v.reshape(B, M, H, dh).transpose(0, 2, 1, 3)
    scores = jnp.einsum('bhid,bhjd->bhij', q, k) * scale + alibi
    attn = jax.nn.softmax(scores, axis=-1)
    out = jnp.einsum('bhij,bhjd->bhid', attn, v)
    out = out.transpose(0, 2, 1, 3).reshape(B, N, D)
    return out @ wo_t + bo


if __name__ == "__main__":
    B, N, M, D = 2, 8, 8, 32   # batch, query seq, context seq, hidden dim
    H = HEADS
    dh = D // H

    key = jax.random.PRNGKey(0)
    ks = jax.random.split(key, 8)

    x = jax.random.normal(ks[0], (B, N, D), dtype=jnp.float32)
    context = jax.random.normal(ks[1], (B, M, D), dtype=jnp.float32)
    alibi = 0.1 * jax.random.normal(ks[2], (B, H, N, M), dtype=jnp.float32)

    # nn.Linear weights are (out, in); we store W^T = (in, out).
    std = 1.0 / jnp.sqrt(D)
    wq_t = std * jax.random.normal(ks[3], (D, D), dtype=jnp.float32)
    wk_t = std * jax.random.normal(ks[4], (D, D), dtype=jnp.float32)
    wv_t = std * jax.random.normal(ks[5], (D, D), dtype=jnp.float32)
    wo_t = std * jax.random.normal(ks[6], (D, D), dtype=jnp.float32)
    bo = 0.01 * jax.random.normal(ks[7], (D,), dtype=jnp.float32)
    gamma = jnp.ones((D,), dtype=jnp.float32)   # LayerNorm defaults
    beta = jnp.zeros((D,), dtype=jnp.float32)

    params = (wq_t, wk_t, wv_t, wo_t, bo, gamma, beta)

    out = cross_attention(x, context, alibi, params)
    out = jax.block_until_ready(out)

    ref = cross_attention_ref(x, context, alibi, params)
    assert out.shape == (B, N, D)
    # bf16 MXU matmuls (f32 accumulation) + bf16 alibi => relaxed tolerance.
    assert jnp.allclose(out, ref, atol=3e-2, rtol=3e-2), "mismatch vs reference"

    print("KERNEL_OK")
</pallas_src>

<mosaic_0001>
module attributes {stable_mosaic.version = 11 : i64} {
  func.func @kv_proj_kernel(%arg0: i32, %arg1: i32, %arg2: memref<1x8x32xf32, #tpu.memory_space<vmem>>, %arg3: memref<32x64xbf16, #tpu.memory_space<vmem>>, %arg4: memref<1x32xf32, #tpu.memory_space<vmem>>, %arg5: memref<1x32xf32, #tpu.memory_space<vmem>>, %arg6: memref<1x8x64xbf16, #tpu.memory_space<vmem>>) attributes {dimension_semantics = [#tpu.dimension_semantics<parallel>, #tpu.dimension_semantics<parallel>], iteration_bounds = array<i64: 2, 1>, scalar_prefetch = 0 : i64, scratch_operands = 0 : i64, tpu.core_type = #tpu.core_type<tc>, window_params = [{transform_indices = @transform_0, window_bounds = array<i64: 1, 8, 32>}, {pipeline_mode = #tpu.pipeline_mode<synchronous>, transform_indices = @transform_1, window_bounds = array<i64: 32, 64>}, {pipeline_mode = #tpu.pipeline_mode<synchronous>, transform_indices = @transform_2, window_bounds = array<i64: 1, 32>}, {pipeline_mode = #tpu.pipeline_mode<synchronous>, transform_indices = @transform_3, window_bounds = array<i64: 1, 32>}, {transform_indices = @transform_4, window_bounds = array<i64: 1, 8, 64>}]} {
    %c0 = arith.constant 0 : index
    %c0_0 = arith.constant 0 : index
    %c0_1 = arith.constant 0 : index
    %0 = vector.load %arg2[%c0, %c0_0, %c0_1] : memref<1x8x32xf32, #tpu.memory_space<vmem>>, vector<1x8x32xf32>
    %1 = vector.shape_cast %0 : vector<1x8x32xf32> to vector<8x32xf32>
    %c0_2 = arith.constant 0 : index
    %c0_3 = arith.constant 0 : index
    %2 = vector.load %arg4[%c0_2, %c0_3] : memref<1x32xf32, #tpu.memory_space<vmem>>, vector<1x32xf32>
    %c0_4 = arith.constant 0 : index
    %c0_5 = arith.constant 0 : index
    %3 = vector.load %arg5[%c0_4, %c0_5] : memref<1x32xf32, #tpu.memory_space<vmem>>, vector<1x32xf32>
    %cst = arith.constant dense<0.000000e+00> : vector<8xf32>
    %4 = vector.multi_reduction <add>, %1, %cst [1] : vector<8x32xf32> to vector<8xf32>
    %5 = vector.shape_cast %4 : vector<8xf32> to vector<8x1xf32>
    %cst_6 = arith.constant 3.200000e+01 : f32
    %6 = vector.broadcast %cst_6 : f32 to vector<8x1xf32>
    %7 = arith.divf %5, %6 : vector<8x1xf32>
    %8 = vector.broadcast %7 : vector<8x1xf32> to vector<8x32xf32>
    %9 = arith.subf %1, %8 : vector<8x32xf32>
    %10 = arith.mulf %9, %9 : vector<8x32xf32>
    %cst_7 = arith.constant dense<0.000000e+00> : vector<8xf32>
    %11 = vector.multi_reduction <add>, %10, %cst_7 [1] : vector<8x32xf32> to vector<8xf32>
    %12 = vector.shape_cast %11 : vector<8xf32> to vector<8x1xf32>
    %cst_8 = arith.constant 3.200000e+01 : f32
    %13 = vector.broadcast %cst_8 : f32 to vector<8x1xf32>
    %14 = arith.divf %12, %13 : vector<8x1xf32>
    %15 = vector.broadcast %7 : vector<8x1xf32> to vector<8x32xf32>
    %16 = arith.subf %1, %15 : vector<8x32xf32>
    %cst_9 = arith.constant 9.99999974E-6 : f32
    %17 = vector.broadcast %cst_9 : f32 to vector<8x1xf32>
    %18 = arith.addf %14, %17 : vector<8x1xf32>
    %19 = math.rsqrt %18 : vector<8x1xf32>
    %20 = vector.broadcast %19 : vector<8x1xf32> to vector<8x32xf32>
    %21 = arith.mulf %16, %20 : vector<8x32xf32>
    %22 = vector.broadcast %2 : vector<1x32xf32> to vector<8x32xf32>
    %23 = arith.mulf %21, %22 : vector<8x32xf32>
    %24 = vector.broadcast %3 : vector<1x32xf32> to vector<8x32xf32>
    %25 = arith.addf %23, %24 : vector<8x32xf32>
    %26 = arith.truncf %25 : vector<8x32xf32> to vector<8x32xbf16>
    %c0_10 = arith.constant 0 : index
    %c0_11 = arith.constant 0 : index
    %27 = vector.load %arg3[%c0_10, %c0_11] : memref<32x64xbf16, #tpu.memory_space<vmem>>, vector<32x64xbf16>
    %cst_12 = arith.constant dense<0.000000e+00> : vector<8x64xf32>
    %28 = tpu.matmul %26, %27, %cst_12 {dimension_numbers = #tpu.dot_dimension_numbers<[1], [0], [0], [1], [0, 0, 1, 1], [], []>} : vector<8x32xbf16>, vector<32x64xbf16>, vector<8x64xf32> -> vector<8x64xf32>
    %29 = arith.truncf %28 : vector<8x64xf32> to vector<8x64xbf16>
    %30 = vector.shape_cast %29 : vector<8x64xbf16> to vector<1x8x64xbf16>
    %c0_13 = arith.constant 0 : index
    %c0_14 = arith.constant 0 : index
    %c0_15 = arith.constant 0 : index
    %31 = vector.load %arg6[%c0_13, %c0_14, %c0_15] : memref<1x8x64xbf16, #tpu.memory_space<vmem>>, vector<1x8x64xbf16>
    tpu.vector_store %arg6[%c0_13, %c0_14, %c0_15], %30 {strides = array<i32>} : memref<1x8x64xbf16, #tpu.memory_space<vmem>>, vector<1x8x64xbf16>,
    return
  }
  func.func @transform_0(%arg0: i32, %arg1: i32) -> (i32, i32, i32) {
    %c0_i32 = arith.constant 0 : i32
    %c0_i32_0 = arith.constant 0 : i32
    return %arg0, %arg1, %c0_i32 : i32, i32, i32
  }
  func.func @transform_1(%arg0: i32, %arg1: i32) -> (i32, i32) {
    %c0_i32 = arith.constant 0 : i32
    %c0_i32_0 = arith.constant 0 : i32
    %c0_i32_1 = arith.constant 0 : i32
    return %c0_i32, %c0_i32_0 : i32, i32
  }
  func.func @transform_2(%arg0: i32, %arg1: i32) -> (i32, i32) {
    %c0_i32 = arith.constant 0 : i32
    %c0_i32_0 = arith.constant 0 : i32
    %c0_i32_1 = arith.constant 0 : i32
    return %c0_i32, %c0_i32_0 : i32, i32
  }
  func.func @transform_3(%arg0: i32, %arg1: i32) -> (i32, i32) {
    %c0_i32 = arith.constant 0 : i32
    %c0_i32_0 = arith.constant 0 : i32
    %c0_i32_1 = arith.constant 0 : i32
    return %c0_i32, %c0_i32_0 : i32, i32
  }
  func.func @transform_4(%arg0: i32, %arg1: i32) -> (i32, i32, i32) {
    %c0_i32 = arith.constant 0 : i32
    %c0_i32_0 = arith.constant 0 : i32
    return %arg0, %arg1, %c0_i32 : i32, i32, i32
  }
}

</mosaic_0001>

<bundles_post_ra>
// kernel: tpu_custom_call.1
= control target key start
LH: loop header
LB: loop body
LE: loop exit
PB: predicated region body
PF: predicated region fallthrough
CT: control target
= control target key end

     0   :  { %9 = vsyncpa [#allocation3], 0  ;;  %s960_s0 = inlined_call_operand.hbm [shape: f32[2,8,32], index: 0, kind: input, shape index: {}]   ;;  %s961_s1 = inlined_call_operand.hbm [shape: bf16[32,64], index: 1, kind: input, shape index: {}]   ;;  %s962_s2 = inlined_call_operand.vmem [shape: f32[1,32], index: 2, kind: input, shape index: {}]   ;;  %s963_s3 = inlined_call_operand.vmem [shape: f32[1,32], index: 3, kind: input, shape index: {}]   ;;  %s964_s4 = inlined_call_operand.hbm [shape: bf16[2,8,64], index: 4, kind: output, shape index: {}]  }
   0x1   :  { %11 = vsyncpa [#allocation3 + $0x1], 0 }
   0x2   :  { %12 = vsyncpa [#allocation6], 0 }
   0x3   :  { %13 = vsyncpa [#allocation4], 0 }
   0x4   :  { %15 = vsyncpa [#allocation4 + $0x1], 0  ;;  %s736_s15 = smov 0   ;;  %s738_s16 = smov 0  }
   0x5   :  { %s740_s17 = smov 0   ;;  %s742_s18 = smov 0  }
   0x6   :  { %s744_s19 = smov 0   ;;  %s746_s20 = smov 0  }
   0x7 LB: > { %s446_s21 = sadd.s32 4294967295, %s702_s20   ;;  %s447_s22 = sadd.s32 4294967294, %s702_s20   ;;  %s702_s20 = sphi %s746_s20, %s21_s20   ;;  %s698_s19 = sphi %s744_s19, %s988_s19   ;;  %s694_s18 = sphi %s742_s18, %s987_s18   ;;  %s690_s17 = sphi %s740_s17, %s986_s17   ;;  %s686_s16 = sphi %s738_s16, %s985_s16   ;;  %s682_s15 = sphi %s736_s15, %s984_s15  }
   0x8   : > { %p55_p0 = scmp.ne.s32.totalorder %s686_s16, %s682_s15  ;;  %p770_p1 = scmp.eq.s32.totalorder %s446_s21, 0 }
   0x9   : > { %p774_p2 = scmp.eq.s32.totalorder %s446_s21, 1  ;;  %p150_p3 = scmp.eq.s32.totalorder %s447_s22, 1 }
   0xa   : > { %s969_s23 = scalar_select %p770_p1, 1, 0 }
   0xb   : > { %s970_s24 = scalar_select %p774_p2, 1, 0 }
   0xc   : > { %p780_p4 = por %p770_p1, %p55_p0  ;;  %p448_p5 = scmp.ge.s32.totalorder %s702_s20, 1 }
   0xd   : > { %p785_p6 = por %p150_p3, %p55_p0  ;;  %p157_p7 = scmp.lt.s32.totalorder %s702_s20, 3 }
   0xe   : > { %s971_s25 = scalar_select %p780_p4, 1, 0 }
   0xf   : > { %s972_s26 = scalar_select %p785_p6, 1, 0 }
  0x10   : > { %p790_p8 = pnand %p448_p5, %p157_p7  ;;  %s704_s28 = smov [#allocation5]  }
  0x11   : > { %s169_s29 = sshll.u32 %s704_s28, 4  ;;  %s33_s5 = sadd.s32 1, %s698_s19  ;;  %s170_s29 = int_to_ptr.vmem [resolvable:$true] %s169_s29 }
  0x12   : > { %s973_s27 = scalar_select %p790_p8, 1, 0 }
  0x13   : > { %p485_p9 = pneg %p790_p8  ;;  %s558_s8 = scalar_lea.hbm %s961_s1, 256 }
  0x14   : > { %p559_p12 = scmp.ne.s32.totalorder %s961_s1, %s558_s8  ;;  %p565_p5 = scmp.lt.u32.totalorder %s558_s8, %s961_s1 }
  0x15   : > { %p799_p11 = pnand %p485_p9, %p770_p1 }
  0x17   : > { %p560_p13 = pneg %p799_p11 }
  0x19   : > { %p561_p0 = pnand %p560_p13, %p559_p12 }
  0x1b   : > { %p562_p3 = pneg %p561_p0 }
  0x1d   : > { %p567_p7 = pnand %p565_p5, %p562_p3 }
  0x1f   : > { %570 = shalt.err (!%p567_p7)
}
  0x20   : > { %s571_s13 = scalar_lea.vmem %s170_s29, 256  ;;  %p579_p1 = scmp.lt.s32.totalorder %s170_s29, %s170_s29 }
  0x21   : > { %p572_p9 = scmp.ne.s32.totalorder %s170_s29, %s571_s13  ;;  %p580_p4 = scmp.lt.s32.totalorder %s571_s13, %s571_s13 }
  0x23   : > { %p574_p10 = pnand %p572_p9, %p560_p13  ;;  %p581_p8 = por %p580_p4, %p579_p1 }
  0x25   : > { %p575_p6 = pneg %p574_p10 }
  0x27   : > { %p582_p2 = pnand %p581_p8, %p575_p6 }
  0x29   : > { %585 = shalt.err (!%p582_p2)
}
  0x2a   : > { %s705_s14 = smov 64   ;;  %s706_s21 = smov 4  }
  0x2b   : > { %488 = dma.hbm_to_vmem [thread:$0]  (!%p799_p11), %s961_s1, 256, %s170_s29, [#allocation6], %s705_s14, %s705_s14, %s706_s21  }
  0x2c   : > { %p35_p1 = scmp.ge.s32.totalorder %s33_s5, 2  ;;  %s42_s6 = sadd.s32 1, %s690_s17 }
  0x2d   : > { %p49_p2 = scmp.ne.s32.totalorder %s690_s17, %s686_s16  ;;  %p50_p4 = scmp.eq.s32.totalorder %s702_s20, 0 }
  0x2e   : > { %s990_s5 = smov (%p35_p1, %s33_s5), 0  ;;  %p976_p8 = scmp.ne.s32.totalorder %s970_s24, 0 }
  0x2f   : > { %p826_p6 = por %p50_p4, %p49_p2  ;;  %s37_s30 = ssub.s32 %s698_s19, %s990_s5 }
  0x30   : > { %p832_p10 = por %p976_p8, %p49_p2  ;;  %p498_p12 = scmp.lt.s32.totalorder %s702_s20, 2 }
  0x31   : > { %p40_p11 = scmp.eq.s32.totalorder %s37_s30, 0  ;;  %s189_s29 = sand.u32 1, %s690_s17  }
  0x32   : > { %s451_s9 = sshll.u32 %s189_s29, 3  ;;  %s452_s11 = sshll.u32 %s698_s19, 7 }
  0x33   : > { %s841_s10 = scalar_select %p40_p11, %s690_s17, %s42_s6  }
  0x34   : > { %s847_s14 = scalar_lea.hbm %s960_s0, %s452_s11  ;;  %s193_s24 = scalar_lea.vmem [#allocation2], %s451_s9 }
  0x35   : > { %s201_s21 = sshll.u32 %s193_s24, 4  ;;  %p853_p13 = pnand %p498_p12, %p826_p6  ;;  %s849_s21 = int_to_ptr.vmem [resolvable:$true] %s201_s21 }
  0x36   : > { %s190_s28 = scalar_lea.sflag [#allocation3], %s189_s29  ;;  %s586_s6 = scalar_lea.hbm %s847_s14, 128 }
  0x37   : > { %p587_p0 = scmp.ne.s32.totalorder %s847_s14, %s586_s6  ;;  %p588_p3 = pneg %p853_p13 }
  0x38   : > { %s591_s11 = scalar_lea.hbm %s960_s0, 256  ;;  %p592_p9 = scmp.lt.u32.totalorder %s847_s14, %s960_s0 }
  0x39   : > { %p589_p5 = pnand %p588_p3, %p587_p0  ;;  %p593_p1 = scmp.lt.u32.totalorder %s591_s11, %s586_s6 }
  0x3a   : > { %p595_p4 = scmp.lt.u32.totalorder %s586_s6, %s847_s14 }
  0x3b   : > { %p590_p7 = pneg %p589_p5  ;;  %p594_p2 = por %p593_p1, %p592_p9 }
  0x3d   : > { %p596_p6 = por %p595_p4, %p594_p2 }
  0x3f   : > { %p597_p8 = pnand %p596_p6, %p590_p7 }
  0x41   : > { %600 = shalt.err (!%p597_p8)
}
  0x42   : > { %s601_s29 = scalar_lea.vmem %s849_s21, 128  ;;  %s707_s13 = smov [#allocation2]  }
  0x43   : > { %p602_p12 = scmp.ne.s32.totalorder %s849_s21, %s601_s29  ;;  %s606_s24 = sshll.u32 %s707_s13, 4  ;;  %s607_s24 = int_to_ptr.vmem [resolvable:$false] %s606_s24 }
  0x44   : > { %s608_s30 = scalar_lea.vmem %s607_s24, 256  ;;  %p609_p5 = scmp.lt.s32.totalorder %s849_s21, %s607_s24 }
  0x45   : > { %p604_p11 = pnand %p602_p12, %p588_p3  ;;  %p610_p9 = scmp.lt.s32.totalorder %s608_s30, %s601_s29 }
  0x47   : > { %p605_p0 = pneg %p604_p11  ;;  %p611_p1 = por %p610_p9, %p609_p5 }
  0x49   : > { %p612_p2 = pnand %p611_p1, %p605_p0 }
  0x4b   : > { %615 = shalt.err (!%p612_p2)
}
  0x4c   : > { %492 = dma.hbm_to_vmem [thread:$0]  (!%p853_p13), %s847_s14, 128, %s849_s21, %s190_s28  }
  0x4d   : > { %p979_p7 = scmp.ne.s32.totalorder %s973_s27, 0 }
  0x4e   : > { %s885_s6 = sand.u32 (!%p979_p7), 1, %s686_s16   ;;  %p980_p3 = scmp.ne.s32.totalorder (!%p979_p7), %s971_s25, 0 }
  0x4f   : > { %210 = sbr.rel (%p979_p7) target bundleno = 634 (0x27a), region = 36  ;;  %s454_s9 = sshll.u32 (!%p979_p7), %s885_s6, 3 }
  0x50   : > { %s213_s11 = scalar_lea.sflag (!%p979_p7), [#allocation3], %s885_s6  ;;  %s216_s7 = scalar_lea.vmem (!%p979_p7), [#allocation2], %s454_s9 }
  0x56   : > { %669 = dma.done.wait (%p980_p3), %s213_s11, 128  }
  0x57   : > { %671 = vsyncadd (%p980_p3), %s213_s11, 4294967168  ;;  %p981_p4 = scmp.ne.s32.totalorder %s969_s23, 0 }
  0x59   : > { %673 = dma.done.wait (%p981_p4), [#allocation6], 256  }
  0x5a   : > { %675 = vsyncadd (%p981_p4), [#allocation6], 4294967040  ;;  %vm249_vm0 = vcmask 261120   ;;  %v246_v0 = vld [vmem:[%s216_s7] sm:$0xff]  ;;  %v554_v7 = vld [vmem:[#allocation5] sm:$0xff]   ;;  %v708_v8 = vmov 0.0  }
  0x5b   : > { %v250_v1 = vsel %vm249_vm0, %v246_v0, 0.0  ;;  %469 = vmatprep.subr.bf16.mxu0 %v708_v8  ;;  %v555_v9 = vld [vmem:[#allocation5 + $0x8] sm:$0xff]   ;;  %vm709_vm1 = vmmov 0   ;;  %v457_v14 = vld [vmem:[%s962_s2] ss:$0 sm:$0xff]  ;;  %s456_s21 = sshll.u32 %s885_s6, 2 }
  0x5c   : > { %251 = vadd.xlane.f32.xlu0 %v250_v1  ;;  %470 = vmatpush3.bf16.msra.mxu0 %v554_v7  ;;  %v458_v16 = vld [vmem:[%s963_s3] ss:$0 sm:$0xff]  ;;  %s463_s22 = sshll.u32 %s694_s18, 6  ;;  %s244_s28 = scalar_lea.vmem [#allocation7], %s456_s21  ;;  %vm339_vm2 = vcmask 519168  }
  0x5d   : > { %473 = vmatprep.mubr.msk.bf16.mxu0 %vm709_vm1, %v708_v8  ;;  %471 = vmatprep.subr.bf16.mxu0 %v708_v8  ;;  %s356_s12 = sshll.u32 %s244_s28, 4  ;;  %s911_s24 = scalar_lea.hbm %s964_s4, %s463_s22  ;;  %s913_s12 = int_to_ptr.vmem [resolvable:$true] %s356_s12 }
  0x5e   : > { %s342_s18 = scalar_lea.sflag [#allocation4], %s885_s6  ;;  %s616_s30 = scalar_lea.vmem %s913_s12, 64 }
  0x5f   : > { %p617_p13 = scmp.ne.s32.totalorder %s913_s12, %s616_s30  ;;  %s710_s9 = smov [#allocation7]  }
  0x60   : > { %472 = vmatpush3.bf16.msra.mxu0 %v555_v9  ;;  %s620_s11 = sshll.u32 %s710_s9, 4  ;;  %s621_s11 = int_to_ptr.vmem [resolvable:$false] %s620_s11 }
  0x61   : > { %p618_p6 = pnand %p617_p13, %p832_p10  ;;  %s622_s7 = scalar_lea.vmem %s621_s11, 128 }
  0x62   : > { %p623_p12 = scmp.lt.s32.totalorder %s913_s12, %s621_s11  ;;  %p624_p11 = scmp.lt.s32.totalorder %s622_s7, %s616_s30 }
  0x63   : > { %p619_p8 = pneg %p618_p6 }
  0x64   : > { %p625_p0 = por %p624_p11, %p623_p12 }
  0x66   : > { %p626_p5 = pnand %p625_p0, %p619_p8 }
  0xe9   : > { %v252_v2 = vpop.xlane.xlu0 %251 }
  0xea   : > { %v254_v3 = vmul.f32 0.03125, %v252_v2 }
  0xec   : > { %v255_v4 = vsub.f32 %v246_v0, %v254_v3 }
  0xee   : > { %v256_v5 = vmul.f32 %v255_v4, %v255_v4 }
  0xf0   : > { %v257_v6 = vsel %vm249_vm0, %v256_v5, 0.0 }
  0xf1   : > { %258 = vadd.xlane.f32.xlu0 %v257_v6 }
 0x17e   : > { %v259_v10 = vpop.xlane.xlu0 %258 }
 0x17f   : > { %v260_v11 = vmul.f32 0.03125, %v259_v10 }
 0x181   : > { %v261_v12 = vadd.f32 1e-05, %v260_v11 }
 0x183   : > { %556 = vrsqrt.f32 %v261_v12 }
 0x18d   : > { %v557_v13 = vpop.eup %556 }
 0x18e   : > { %v263_v15 = vmul.f32 %v557_v13, %v255_v4 }
 0x190   : > { %v270_v17 = vmul.f32 %v457_v14, %v263_v15 }
 0x192   : > { %v277_v18 = vadd.f32 %v458_v16, %v270_v17 }
 0x194   : > { %v278_v19 = vpack.c.bf16 %v277_v18, %v277_v18 }
 0x196   : > { %474 = vmatmul.mubr.msk.bf16.vlgmr.msra.gmra.mrb[0].mxu0 %vm249_vm0, %v278_v19 }
 0x269   : > { %v332_v20 = vpop.f32.mrb[0].mxu0 }
 0x26a   : > { %v338_v21 = vpack.c.bf16 %v332_v20, %v332_v20  ;;  %v475_v22 = vpop.f32.mrb[1].mxu0 }
 0x26b   : > { %v335_v23 = vpop.f32.mrb[2].mxu0 }
 0x26c   : > { %v476_v24 = vpop.f32.mrb[3].mxu0  ;;  %340 = vst.msk [vmem:[%s244_s28] sm:$0xf] %vm339_vm2, %v338_v21 }
 0x26d   : > { %629 = shalt.err (!%p626_p5)
}
 0x26e   : > { %s630_s6 = scalar_lea.hbm %s911_s24, 64  ;;  %s634_s27 = scalar_lea.hbm %s964_s4, 128 }
 0x26f   : > { %p631_p9 = scmp.ne.s32.totalorder %s911_s24, %s630_s6  ;;  %p635_p7 = scmp.lt.u32.totalorder %s911_s24, %s964_s4 }
 0x270   : > { %p636_p3 = scmp.lt.u32.totalorder %s634_s27, %s630_s6  ;;  %p638_p13 = scmp.lt.u32.totalorder %s630_s6, %s911_s24 }
 0x271   : > { %p632_p1 = pnand %p631_p9, %p832_p10 }
 0x272   : > { %p637_p4 = por %p636_p3, %p635_p7 }
 0x273   : > { %p633_p2 = pneg %p632_p1 }
 0x274   : > { %p639_p6 = por %p638_p13, %p637_p4 }
 0x276   : > { %p640_p8 = pnand %p639_p6, %p633_p2 }
 0x278   : > { %643 = shalt.err (!%p640_p8)
}
 0x279   : > { %483 = dma.vmem_to_hbm [thread:$0]  (%p832_p10), %s913_s12, 64, %s911_s24, %s342_s18  }
 0x27a PF: > { %s368_s22 = sand.u32 1, %s682_s15   ;;  %p982_p12 = scmp.ne.s32.totalorder %s972_s26, 0 }
 0x27b   : > { %p983_p11 = scmp.ge.s32.totalorder %s702_s20, 2  ;;  %s369_s28 = scalar_lea.sflag [#allocation4], %s368_s22 }
 0x27d   : > { %p494_p0 = pnand %p983_p11, %p982_p12 }
 0x27f   : > { %677 = dma.done.wait (!%p494_p0), %s369_s28, 64  }
 0x280   : > { %679 = vsyncadd (!%p494_p0), %s369_s28, 4294967232  ;;  %s21_s20 = sadd.s32 1, %s702_s20   ;;  %s984_s15 = smov %s686_s16 }
 0x281   : > { %p18_p5 = scmp.ge.s32.totalorder %s21_s20, 4   ;;  %s985_s16 = smov %s690_s17 }
 0x282   : > { %s986_s17 = smov %s841_s10  ;;  %s987_s18 = smov %s698_s19 }
 0x283   : > { %s988_s19 = smov %s990_s5  ;;  %20 = sbr.rel (!%p18_p5) target bundleno = 7 (0x7), region = 85 }
 0x28a   :  { %374 = vsyncpa [#allocation3], 1 }
 0x28b   :  { %376 = vsyncpa [#allocation3 + $0x1], 1 }
 0x28c   :  { %377 = vsyncpa [#allocation6], 1 }
 0x28d   :  { %378 = vsyncpa [#allocation4], 1 }
 0x28e   :  { %380 = vsyncpa [#allocation4 + $0x1], 1 }

</bundles_post_ra>
